<compile_context>
chip_gen: v5e
topology: v5e:2x2
jax: 0.10.0
libtpu: 0.0.40
codegen_flags: <defaults>
</compile_context>

<pallas_src>
import functools

import jax
import jax.numpy as jnp
from jax.experimental import pallas as pl
from jax.experimental.pallas import tpu as pltpu


S_DIM = 4
P_DIM = 9
HIDDEN_DIMS = (128, 64)
_LANE = 128


def _round_up(x, m):
    return (x + m - 1) // m * m


def _cdiv(a, b):
    return (a + b - 1) // b


def _gaussian_forward_kernel(
    s_ref,               # (S_DIM, TB)   streamed input, batch on lanes
    w1_ref, b1_ref,      # (H1, S_DIM), (H1, 1)
    w2_ref, b2_ref,      # (H2, H1),    (H2, 1)
    wmu_ref, bmu_ref,    # (P_DIM, H2), (P_DIM, 1)
    wls_ref, bls_ref,    # (P_DIM, H2), (P_DIM, 1)
    mu_ref,              # (P_DIM, TB)  streamed output
    ls_ref,              # (P_DIM, TB)  streamed output
):
    x = s_ref[...]                                                    # (4, TB)

    # backbone layer 1: Linear + tanh (K=4 matmul; tanh runs on the EUP slot)
    h1 = jnp.tanh(
        jnp.dot(w1_ref[...], x, preferred_element_type=jnp.float32) + b1_ref[...]
    )                                                                 # (128, TB)

    # backbone layer 2: Linear + tanh
    h2 = jnp.tanh(
        jnp.dot(w2_ref[...], h1, preferred_element_type=jnp.float32) + b2_ref[...]
    )                                                                 # (64, TB)

    # heads: two small-M matmuls, two lane-dense full-tile stores
    mu_ref[...] = (
        jnp.dot(wmu_ref[...], h2, preferred_element_type=jnp.float32) + bmu_ref[...]
    )
    ls_ref[...] = (
        jnp.dot(wls_ref[...], h2, preferred_element_type=jnp.float32) + bls_ref[...]
    )


@functools.partial(jax.jit, static_argnames=("block_b",))
def gaussian_forward(S, params, *, block_b=8192):
    """S: (B, S_DIM) float32 -> (mu, log_sigma), each (B, P_DIM) float32."""
    B = S.shape[0]
    w1, b1, w2, b2, wmu, bmu, wls, bls = params
    H1, H2 = HIDDEN_DIMS

    # ---- batch tiling ------------------------------------------------------
    # Lane-align B to 128, then split into near-equal 128-aligned tiles that
    # exactly divide B_pad (no partial blocks).  Force >=2 tiles once there is
    # enough work so the "parallel" grid axis can feed both v7x TensorCores.
    B_lane = _round_up(B, _LANE)
    n_tiles = _cdiv(B_lane, block_b)
    if n_tiles < 2 and B_lane >= 2048:
        n_tiles = 2
    TB = _round_up(_cdiv(B_lane, n_tiles), _LANE)
    B_pad = TB * n_tiles

    # Feature-major layout: batch on the lane axis.  Padded columns are zeros
    # and stay isolated (matmuls only mix feature dims); they're trimmed below.
    S_t = jnp.pad(S, ((0, B_pad - B), (0, 0))).T                 # (S_DIM, B_pad)

    resident = lambda arr: pl.BlockSpec(arr.shape, lambda i: (0, 0))
    stream = lambda rows: pl.BlockSpec((rows, TB), lambda i: (0, i))

    # Advisory cost estimate (this op is HBM/EUP bound, not MXU bound).
    flops = 2 * B_pad * (S_DIM * H1 + H1 * H2 + 2 * H2 * P_DIM)
    transcendentals = B_pad * (H1 + H2)
    weight_elems = (H1 * S_DIM + H1) + (H2 * H1 + H2) + 2 * (P_DIM * H2 + P_DIM)
    bytes_accessed = 4 * (B_pad * (S_DIM + 2 * P_DIM) + weight_elems)

    # VMEM working set (f32): double-buffered streamed input (4->8 sublanes),
    # h1/h2 activations, two double-buffered streamed outputs (9->16 sublanes),
    # plus slack for the resident weights.  Clamp into [32 MiB, 64 MiB] so the
    # v5e 16 MiB scoped default is raised and the v7x 64 MiB physical cap holds.
    vmem_est = 4 * TB * (2 * 8 + H1 + H2 + 2 * 2 * 16) + (2 << 20)
    vmem_limit = int(min(max(2 * vmem_est, 32 * 1024 * 1024), 64 * 1024 * 1024))

    mu_t, ls_t = pl.pallas_call(
        _gaussian_forward_kernel,
        out_shape=(
            jax.ShapeDtypeStruct((P_DIM, B_pad), jnp.float32),
            jax.ShapeDtypeStruct((P_DIM, B_pad), jnp.float32),
        ),
        grid=(n_tiles,),
        in_specs=[
            stream(S_DIM),                      # streamed batch tiles of S^T
            resident(w1), resident(b1),
            resident(w2), resident(b2),
            resident(wmu), resident(bmu),
            resident(wls), resident(bls),
        ],
        out_specs=(stream(P_DIM), stream(P_DIM)),
        compiler_params=pltpu.CompilerParams(
            dimension_semantics=("parallel",),
            vmem_limit_bytes=vmem_limit,
        ),
        cost_estimate=pl.CostEstimate(
            flops=flops,
            transcendentals=transcendentals,
            bytes_accessed=bytes_accessed,
        ),
    )(S_t, w1, b1, w2, b2, wmu, bmu, wls, bls)

    # Each head is its own output -> only a trim + transpose back to (B, P_DIM)
    # (one fused XLA transpose each; no minor-dim head-split gather copies).
    mu = mu_t[:, :B].T
    log_sigma = ls_t[:, :B].T
    return mu, log_sigma


def init_params(key, s_dim=S_DIM, p_dim=P_DIM, hidden_dims=HIDDEN_DIMS):
    """PyTorch-native layout: W (out, in), b (out, 1); U(-1/sqrt(fan_in), +)."""
    dims = [s_dim] + list(hidden_dims)
    keys = jax.random.split(key, 2 * (len(hidden_dims) + 2))
    ki = 0
    params = []

    def linear(fan_in, fan_out):
        nonlocal ki
        bound = 1.0 / jnp.sqrt(fan_in)
        w = jax.random.uniform(keys[ki], (fan_out, fan_in), jnp.float32, -bound, bound)
        b = jax.random.uniform(keys[ki + 1], (fan_out, 1), jnp.float32, -bound, bound)
        ki += 2
        return w, b

    for i in range(len(hidden_dims)):
        params += linear(dims[i], dims[i + 1])
    params += linear(dims[-1], p_dim)      # mu head
    params += linear(dims[-1], p_dim)      # log_sigma head
    return tuple(params)


def reference_forward(S, params):
    w1, b1, w2, b2, wmu, bmu, wls, bls = params
    h = jnp.tanh(S @ w1.T + b1[:, 0])
    h = jnp.tanh(h @ w2.T + b2[:, 0])
    return h @ wmu.T + bmu[:, 0], h @ wls.T + bls[:, 0]


if __name__ == "__main__":
    key = jax.random.PRNGKey(0)
    pkey, skey, skey2 = jax.random.split(key, 3)

    params = init_params(pkey)

    # Small shape consistent with the module (batch=8, S_dim=4).
    B = 8
    S = jax.random.normal(skey, (B, S_DIM), jnp.float32)

    mu, log_sigma = gaussian_forward(S, params)
    jax.block_until_ready((mu, log_sigma))

    mu_ref, ls_ref = reference_forward(S, params)
    assert mu.shape == (B, P_DIM) and log_sigma.shape == (B, P_DIM)
    assert jnp.allclose(mu, mu_ref, atol=1e-5, rtol=1e-5)
    assert jnp.allclose(log_sigma, ls_ref, atol=1e-5, rtol=1e-5)

    # Exercise the multi-tile / lane-padded path (B not a multiple of 128,
    # forces >=2 batch tiles -> v7x dual-TensorCore path).
    B2 = 2500
    S2 = jax.random.normal(skey2, (B2, S_DIM), jnp.float32)
    mu2, ls2 = gaussian_forward(S2, params)
    jax.block_until_ready((mu2, ls2))
    mu2_ref, ls2_ref = reference_forward(S2, params)
    assert mu2.shape == (B2, P_DIM) and ls2.shape == (B2, P_DIM)
    assert jnp.allclose(mu2, mu2_ref, atol=1e-5, rtol=1e-5)
    assert jnp.allclose(ls2, ls2_ref, atol=1e-5, rtol=1e-5)

    print("KERNEL_OK")
</pallas_src>

<mosaic_0001>
module attributes {stable_mosaic.version = 11 : i64} {
  func.func @_gaussian_forward_kernel(%arg0: i32, %arg1: memref<4x128xf32, #tpu.memory_space<vmem>>, %arg2: memref<128x4xf32, #tpu.memory_space<vmem>>, %arg3: memref<128x1xf32, #tpu.memory_space<vmem>>, %arg4: memref<64x128xf32, #tpu.memory_space<vmem>>, %arg5: memref<64x1xf32, #tpu.memory_space<vmem>>, %arg6: memref<9x64xf32, #tpu.memory_space<vmem>>, %arg7: memref<9x1xf32, #tpu.memory_space<vmem>>, %arg8: memref<9x64xf32, #tpu.memory_space<vmem>>, %arg9: memref<9x1xf32, #tpu.memory_space<vmem>>, %arg10: memref<9x128xf32, #tpu.memory_space<vmem>>, %arg11: memref<9x128xf32, #tpu.memory_space<vmem>>) attributes {dimension_semantics = [#tpu.dimension_semantics<parallel>], iteration_bounds = array<i64: 1>, scalar_prefetch = 0 : i64, scratch_operands = 0 : i64, tpu.core_type = #tpu.core_type<tc>, window_params = [{transform_indices = @transform_0, window_bounds = array<i64: 4, 128>}, {pipeline_mode = #tpu.pipeline_mode<synchronous>, transform_indices = @transform_1, window_bounds = array<i64: 128, 4>}, {pipeline_mode = #tpu.pipeline_mode<synchronous>, transform_indices = @transform_2, window_bounds = array<i64: 128, 1>}, {pipeline_mode = #tpu.pipeline_mode<synchronous>, transform_indices = @transform_3, window_bounds = array<i64: 64, 128>}, {pipeline_mode = #tpu.pipeline_mode<synchronous>, transform_indices = @transform_4, window_bounds = array<i64: 64, 1>}, {pipeline_mode = #tpu.pipeline_mode<synchronous>, transform_indices = @transform_5, window_bounds = array<i64: 9, 64>}, {pipeline_mode = #tpu.pipeline_mode<synchronous>, transform_indices = @transform_6, window_bounds = array<i64: 9, 1>}, {pipeline_mode = #tpu.pipeline_mode<synchronous>, transform_indices = @transform_7, window_bounds = array<i64: 9, 64>}, {pipeline_mode = #tpu.pipeline_mode<synchronous>, transform_indices = @transform_8, window_bounds = array<i64: 9, 1>}, {transform_indices = @transform_9, window_bounds = array<i64: 9, 128>}, {transform_indices = @transform_10, window_bounds = array<i64: 9, 128>}]} {
    %c0 = arith.constant 0 : index
    %c0_0 = arith.constant 0 : index
    %0 = vector.load %arg1[%c0, %c0_0] : memref<4x128xf32, #tpu.memory_space<vmem>>, vector<4x128xf32>
    %c0_1 = arith.constant 0 : index
    %c0_2 = arith.constant 0 : index
    %1 = vector.load %arg2[%c0_1, %c0_2] : memref<128x4xf32, #tpu.memory_space<vmem>>, vector<128x4xf32>
    %cst = arith.constant dense<0.000000e+00> : vector<128x128xf32>
    %2 = tpu.matmul %1, %0, %cst {dimension_numbers = #tpu.dot_dimension_numbers<[1], [0], [0], [1], [0, 0, 1, 1], [], []>} : vector<128x4xf32>, vector<4x128xf32>, vector<128x128xf32> -> vector<128x128xf32>
    %c0_3 = arith.constant 0 : index
    %c0_4 = arith.constant 0 : index
    %3 = vector.load %arg3[%c0_3, %c0_4] : memref<128x1xf32, #tpu.memory_space<vmem>>, vector<128x1xf32>
    %4 = vector.broadcast %3 : vector<128x1xf32> to vector<128x128xf32>
    %5 = arith.addf %2, %4 : vector<128x128xf32>
    %6 = math.tanh %5 : vector<128x128xf32>
    %c0_5 = arith.constant 0 : index
    %c0_6 = arith.constant 0 : index
    %7 = vector.load %arg4[%c0_5, %c0_6] : memref<64x128xf32, #tpu.memory_space<vmem>>, vector<64x128xf32>
    %cst_7 = arith.constant dense<0.000000e+00> : vector<64x128xf32>
    %8 = tpu.matmul %7, %6, %cst_7 {dimension_numbers = #tpu.dot_dimension_numbers<[1], [0], [0], [1], [0, 0, 1, 1], [], []>} : vector<64x128xf32>, vector<128x128xf32>, vector<64x128xf32> -> vector<64x128xf32>
    %c0_8 = arith.constant 0 : index
    %c0_9 = arith.constant 0 : index
    %9 = vector.load %arg5[%c0_8, %c0_9] : memref<64x1xf32, #tpu.memory_space<vmem>>, vector<64x1xf32>
    %10 = vector.broadcast %9 : vector<64x1xf32> to vector<64x128xf32>
    %11 = arith.addf %8, %10 : vector<64x128xf32>
    %12 = math.tanh %11 : vector<64x128xf32>
    %c0_10 = arith.constant 0 : index
    %c0_11 = arith.constant 0 : index
    %13 = vector.load %arg6[%c0_10, %c0_11] : memref<9x64xf32, #tpu.memory_space<vmem>>, vector<9x64xf32>
    %cst_12 = arith.constant dense<0.000000e+00> : vector<9x128xf32>
    %14 = tpu.matmul %13, %12, %cst_12 {dimension_numbers = #tpu.dot_dimension_numbers<[1], [0], [0], [1], [0, 0, 1, 1], [], []>} : vector<9x64xf32>, vector<64x128xf32>, vector<9x128xf32> -> vector<9x128xf32>
    %c0_13 = arith.constant 0 : index
    %c0_14 = arith.constant 0 : index
    %15 = vector.load %arg7[%c0_13, %c0_14] : memref<9x1xf32, #tpu.memory_space<vmem>>, vector<9x1xf32>
    %16 = vector.broadcast %15 : vector<9x1xf32> to vector<9x128xf32>
    %17 = arith.addf %14, %16 : vector<9x128xf32>
    %c0_15 = arith.constant 0 : index
    %c0_16 = arith.constant 0 : index
    %18 = vector.load %arg10[%c0_15, %c0_16] : memref<9x128xf32, #tpu.memory_space<vmem>>, vector<9x128xf32>
    tpu.vector_store %arg10[%c0_15, %c0_16], %17 {strides = array<i32>} : memref<9x128xf32, #tpu.memory_space<vmem>>, vector<9x128xf32>,
    %c0_17 = arith.constant 0 : index
    %c0_18 = arith.constant 0 : index
    %19 = vector.load %arg8[%c0_17, %c0_18] : memref<9x64xf32, #tpu.memory_space<vmem>>, vector<9x64xf32>
    %cst_19 = arith.constant dense<0.000000e+00> : vector<9x128xf32>
    %20 = tpu.matmul %19, %12, %cst_19 {dimension_numbers = #tpu.dot_dimension_numbers<[1], [0], [0], [1], [0, 0, 1, 1], [], []>} : vector<9x64xf32>, vector<64x128xf32>, vector<9x128xf32> -> vector<9x128xf32>
    %c0_20 = arith.constant 0 : index
    %c0_21 = arith.constant 0 : index
    %21 = vector.load %arg9[%c0_20, %c0_21] : memref<9x1xf32, #tpu.memory_space<vmem>>, vector<9x1xf32>
    %22 = vector.broadcast %21 : vector<9x1xf32> to vector<9x128xf32>
    %23 = arith.addf %20, %22 : vector<9x128xf32>
    %c0_22 = arith.constant 0 : index
    %c0_23 = arith.constant 0 : index
    %24 = vector.load %arg11[%c0_22, %c0_23] : memref<9x128xf32, #tpu.memory_space<vmem>>, vector<9x128xf32>
    tpu.vector_store %arg11[%c0_22, %c0_23], %23 {strides = array<i32>} : memref<9x128xf32, #tpu.memory_space<vmem>>, vector<9x128xf32>,
    return
  }
  func.func @transform_0(%arg0: i32) -> (i32, i32) {
    %c0_i32 = arith.constant 0 : i32
    %c0_i32_0 = arith.constant 0 : i32
    return %c0_i32, %arg0 : i32, i32
  }
  func.func @transform_1(%arg0: i32) -> (i32, i32) {
    %c0_i32 = arith.constant 0 : i32
    %c0_i32_0 = arith.constant 0 : i32
    %c0_i32_1 = arith.constant 0 : i32
    return %c0_i32, %c0_i32_0 : i32, i32
  }
  func.func @transform_2(%arg0: i32) -> (i32, i32) {
    %c0_i32 = arith.constant 0 : i32
    %c0_i32_0 = arith.constant 0 : i32
    %c0_i32_1 = arith.constant 0 : i32
    return %c0_i32, %c0_i32_0 : i32, i32
  }
  func.func @transform_3(%arg0: i32) -> (i32, i32) {
    %c0_i32 = arith.constant 0 : i32
    %c0_i32_0 = arith.constant 0 : i32
    %c0_i32_1 = arith.constant 0 : i32
    return %c0_i32, %c0_i32_0 : i32, i32
  }
  func.func @transform_4(%arg0: i32) -> (i32, i32) {
    %c0_i32 = arith.constant 0 : i32
    %c0_i32_0 = arith.constant 0 : i32
    %c0_i32_1 = arith.constant 0 : i32
    return %c0_i32, %c0_i32_0 : i32, i32
  }
  func.func @transform_5(%arg0: i32) -> (i32, i32) {
    %c0_i32 = arith.constant 0 : i32
    %c0_i32_0 = arith.constant 0 : i32
    %c0_i32_1 = arith.constant 0 : i32
    return %c0_i32, %c0_i32_0 : i32, i32
  }
  func.func @transform_6(%arg0: i32) -> (i32, i32) {
    %c0_i32 = arith.constant 0 : i32
    %c0_i32_0 = arith.constant 0 : i32
    %c0_i32_1 = arith.constant 0 : i32
    return %c0_i32, %c0_i32_0 : i32, i32
  }
  func.func @transform_7(%arg0: i32) -> (i32, i32) {
    %c0_i32 = arith.constant 0 : i32
    %c0_i32_0 = arith.constant 0 : i32
    %c0_i32_1 = arith.constant 0 : i32
    return %c0_i32, %c0_i32_0 : i32, i32
  }
  func.func @transform_8(%arg0: i32) -> (i32, i32) {
    %c0_i32 = arith.constant 0 : i32
    %c0_i32_0 = arith.constant 0 : i32
    %c0_i32_1 = arith.constant 0 : i32
    return %c0_i32, %c0_i32_0 : i32, i32
  }
  func.func @transform_9(%arg0: i32) -> (i32, i32) {
    %c0_i32 = arith.constant 0 : i32
    %c0_i32_0 = arith.constant 0 : i32
    return %c0_i32, %arg0 : i32, i32
  }
  func.func @transform_10(%arg0: i32) -> (i32, i32) {
    %c0_i32 = arith.constant 0 : i32
    %c0_i32_0 = arith.constant 0 : i32
    return %c0_i32, %arg0 : i32, i32
  }
}

</mosaic_0001>

<bundles_post_ra>
// kernel: gaussian_forward.1
= control target key start
LH: loop header
LB: loop body
LE: loop exit
PB: predicated region body
PF: predicated region fallthrough
CT: control target
= control target key end

     0   :  { %vm196_vm0 = vcmask 1043456   ;;  %v575_v0 = vmov 0   ;;  %vm147_vm1 = vcmask 31744   ;;  %vm400_vm2 = vcmask 523264   ;;  %s842_s2 = inlined_call_operand.vmem [shape: f32[128,1], index: 2, kind: input, shape index: {}]   ;;  %s843_s0 = inlined_call_operand.vmem [shape: f32[4,128], index: 0, kind: input, shape index: {}]   ;;  %s844_s1 = inlined_call_operand.vmem [shape: f32[128,4], index: 1, kind: input, shape index: {}]   ;;  %s845_s4 = inlined_call_operand.vmem [shape: f32[64,1], index: 4, kind: input, shape index: {}]   ;;  %s846_s6 = inlined_call_operand.vmem [shape: f32[9,1], index: 6, kind: input, shape index: {}]   ;;  %s847_s8 = inlined_call_operand.vmem [shape: f32[9,1], index: 8, kind: input, shape index: {}]   ;;  %s848_s3 = inlined_call_operand.vmem [shape: f32[64,128], index: 3, kind: input, shape index: {}]   ;;  %s849_s5 = inlined_call_operand.vmem [shape: f32[9,64], index: 5, kind: input, shape index: {}]   ;;  %s850_s7 = inlined_call_operand.vmem [shape: f32[9,64], index: 7, kind: input, shape index: {}]   ;;  %s851_s9 = inlined_call_operand.vmem [shape: f32[9,128], index: 9, kind: output, shape index: {0}]   ;;  %s852_s10 = inlined_call_operand.vmem [shape: f32[9,128], index: 10, kind: output, shape index: {1}]  }
   0x1   :  { %525 = vset.pattern.permute.xlu1 %v575_v0  ;;  %524 = vset.pattern.permute.xlu0 %v575_v0  ;;  %v66_v1 = vld [vmem:[%s842_s2 + $0x78] sm:$0xff]  ;;  %v64_v2 = vld [vmem:[%s842_s2 + $0x68] sm:$0xff]  ;;  %v34_v3 = vld [vmem:[%s843_s0] sm:$0xf] }
   0x2   :  { %144 = vperm.xlu0 %524, %v66_v1   ;;  %134 = vperm.xlu1 %525, %v64_v2   ;;  %v35_v4 = vld [vmem:[%s844_s1] sm:$0xff]  ;;  %v44_v5 = vld [vmem:[%s844_s1 + $0x48] sm:$0xff]  ;;  %v62_v6 = vld [vmem:[%s842_s2 + $0x58] sm:$0xff] }
   0x3   :  { %485 = vmatpush.msk.msra.mxu0 %vm196_vm0, %v34_v3  ;;  %506 = vmatpush.msk.msra.mxu2 %vm196_vm0, %v34_v3  ;;  %v65_v7 = vld [vmem:[%s842_s2 + $0x70] sm:$0xff]  ;;  %v63_v8 = vld [vmem:[%s842_s2 + $0x60] sm:$0xff]  ;;  %v36_v9 = vld [vmem:[%s844_s1 + $0x8] sm:$0xff] }
   0x4   :  { %486 = vmatmul.msk.f32.vlgmr.msra.gmra.mxu0 %vm147_vm1, %v35_v4  ;;  %495 = vmatmul.msk.f32.vlgmr.msra.gmra.mxu2 %vm147_vm1, %v44_v5  ;;  %v45_v10 = vld [vmem:[%s844_s1 + $0x50] sm:$0xff]  ;;  %v60_v12 = vld [vmem:[%s842_s2 + $0x48] sm:$0xff]  ;;  %v59_v13 = vld [vmem:[%s842_s2 + $0x40] sm:$0xff] }
   0x5   :  { %526 = vset.pattern.permute.xlu2 %v575_v0  ;;  %v61_v11 = vld [vmem:[%s842_s2 + $0x50] sm:$0xff]  ;;  %v46_v15 = vld [vmem:[%s844_s1 + $0x58] sm:$0xff]  ;;  %v56_v18 = vld [vmem:[%s842_s2 + $0x28] sm:$0xff] }
   0x6   :  { %124 = vperm.xlu2 %526, %v62_v6   ;;  %v37_v14 = vld [vmem:[%s844_s1 + $0x10] sm:$0xff]  ;;  %v58_v16 = vld [vmem:[%s842_s2 + $0x38] sm:$0xff]  ;;  %v47_v20 = vld [vmem:[%s844_s1 + $0x60] sm:$0xff] }
   0x7   :  { %v57_v17 = vld [vmem:[%s842_s2 + $0x30] sm:$0xff]  ;;  %v38_v19 = vld [vmem:[%s844_s1 + $0x18] sm:$0xff]  ;;  %v55_v21 = vld [vmem:[%s842_s2 + $0x20] sm:$0xff] }
   0x8   :  { %v54_v22 = vld [vmem:[%s842_s2 + $0x18] sm:$0xff]  ;;  %v53_v23 = vld [vmem:[%s842_s2 + $0x10] sm:$0xff]  ;;  %v39_v24 = vld [vmem:[%s844_s1 + $0x20] sm:$0xff] }
   0x9   :  { %v48_v25 = vld [vmem:[%s844_s1 + $0x68] sm:$0xff]  ;;  %v296_v27 = vld [vmem:[%s845_s4 + $0x38] sm:$0xff]  ;;  %v51_v28 = vld [vmem:[%s842_s2] sm:$0xff] }
   0xa   :  { %139 = vperm.xlu0 %524, %v65_v7   ;;  %129 = vperm.xlu1 %525, %v63_v8   ;;  %v52_v26 = vld [vmem:[%s842_s2 + $0x8] sm:$0xff]  ;;  %v49_v30 = vld [vmem:[%s844_s1 + $0x70] sm:$0xff]  ;;  %v293_v32 = vld [vmem:[%s845_s4 + $0x20] sm:$0xff] }
   0xb   :  { %v40_v29 = vld [vmem:[%s844_s1 + $0x28] sm:$0xff]  ;;  %v295_v31 = vld [vmem:[%s845_s4 + $0x30] sm:$0xff]  ;;  %v50_v35 = vld [vmem:[%s844_s1 + $0x78] sm:$0xff] }
   0xc   :  { %487 = vmatmul.msk.f32.gmra.mxu0 %vm147_vm1, %v36_v9  ;;  %496 = vmatmul.msk.f32.gmra.mxu2 %vm147_vm1, %v45_v10  ;;  %v294_v33 = vld [vmem:[%s845_s4 + $0x28] sm:$0xff]  ;;  %v41_v34 = vld [vmem:[%s844_s1 + $0x30] sm:$0xff]  ;;  %v292_v36 = vld [vmem:[%s845_s4 + $0x18] sm:$0xff] }
   0xd   :  { %v290_v37 = vld [vmem:[%s845_s4 + $0x8] sm:$0xff]  ;;  %v291_v38 = vld [vmem:[%s845_s4 + $0x10] sm:$0xff]  ;;  %v42_v39 = vld [vmem:[%s844_s1 + $0x38] sm:$0xff] }
   0xe   :  { %119 = vperm.xlu2 %526, %v61_v11   ;;  %v289_v40 = vld [vmem:[%s845_s4] sm:$0xff]  ;;  %v389_v41 = vld [vmem:[%s846_s6 + $0x8] sm:$0x1] }
   0xf   :  { %v388_v42 = vld [vmem:[%s846_s6] sm:$0xff]  ;;  %v435_v45 = vld [vmem:[%s847_s8 + $0x8] sm:$0x1] }
  0x10   :  { %v43_v43 = vld [vmem:[%s844_s1 + $0x40] sm:$0xff] }
  0x11   :  { %v434_v44 = vld [vmem:[%s847_s8] sm:$0xff] }
  0x12   :  { %114 = vperm.xlu0 %524, %v60_v12   ;;  %109 = vperm.xlu1 %525, %v59_v13  }
  0x14   :  { %488 = vmatmul.msk.f32.gmra.mxu0 %vm147_vm1, %v37_v14  ;;  %497 = vmatmul.msk.f32.gmra.mxu2 %vm147_vm1, %v46_v15 }
  0x16   :  { %104 = vperm.xlu2 %526, %v58_v16  }
  0x1a   :  { %99 = vperm.xlu0 %524, %v57_v17   ;;  %94 = vperm.xlu1 %525, %v56_v18  }
  0x1c   :  { %489 = vmatmul.msk.f32.gmra.mxu0 %vm147_vm1, %v38_v19  ;;  %498 = vmatmul.msk.f32.gmra.mxu2 %vm147_vm1, %v47_v20 }
  0x1e   :  { %89 = vperm.xlu2 %526, %v55_v21  }
  0x22   :  { %84 = vperm.xlu0 %524, %v54_v22   ;;  %79 = vperm.xlu1 %525, %v53_v23  }
  0x24   :  { %490 = vmatmul.msk.f32.gmra.mxu0 %vm147_vm1, %v39_v24  ;;  %499 = vmatmul.msk.f32.gmra.mxu2 %vm147_vm1, %v48_v25 }
  0x26   :  { %74 = vperm.xlu2 %526, %v52_v26  }
  0x2a   :  { %334 = vperm.xlu1 %525, %v296_v27   ;;  %69 = vperm.xlu0 %524, %v51_v28  }
  0x2c   :  { %491 = vmatmul.msk.f32.gmra.mxu0 %vm147_vm1, %v40_v29  ;;  %500 = vmatmul.msk.f32.gmra.mxu2 %vm147_vm1, %v49_v30 }
  0x2e   :  { %329 = vperm.xlu2 %526, %v295_v31  }
  0x32   :  { %319 = vperm.xlu1 %525, %v293_v32   ;;  %324 = vperm.xlu0 %524, %v294_v33  }
  0x34   :  { %492 = vmatmul.msk.f32.gmra.mxu0 %vm147_vm1, %v41_v34  ;;  %501 = vmatmul.msk.f32.gmra.mxu2 %vm147_vm1, %v50_v35 }
  0x36   :  { %314 = vperm.xlu2 %526, %v292_v36  }
  0x3a   :  { %304 = vperm.xlu1 %525, %v290_v37   ;;  %309 = vperm.xlu0 %524, %v291_v38  }
  0x3c   :  { %493 = vmatmul.msk.f32.gmra.mxu0 %vm147_vm1, %v42_v39 }
  0x3e   :  { %299 = vperm.xlu2 %526, %v289_v40  }
  0x42   :  { %397 = vperm.xlu1 %525, %v389_v41   ;;  %392 = vperm.xlu0 %524, %v388_v42  }
  0x44   :  { %494 = vmatmul.msk.f32.gmra.mxu0 %vm147_vm1, %v43_v43 }
  0x46   :  { %438 = vperm.xlu2 %526, %v434_v44  }
  0x4a   :  { %443 = vperm.xlu0 %524, %v435_v45   ;;  %v281_v45 = vld [vmem:[%s848_s3] sm:$0xff] }
  0x60   :  { %v125_v57 = vpop.permute.xlu2 %124 }
  0x68   :  { %v120_v63 = vpop.permute.xlu2 %119 }
  0x70   :  { %v105_v8 = vpop.permute.xlu2 %104 }
  0x74   :  { %v145_v53 = vpop.permute.xlu0 %144  ;;  %v135_v56 = vpop.permute.xlu1 %134 }
  0x78   :  { %v90_v20 = vpop.permute.xlu2 %89 }
  0x7c   :  { %v140_v59 = vpop.permute.xlu0 %139  ;;  %v130_v61 = vpop.permute.xlu1 %129 }
  0x80   :  { %v75_v33 = vpop.permute.xlu2 %74 }
  0x81   :  { %v782_v46 = vpop.f32.mrf.mxu0 }
  0x84   :  { %v115_v1 = vpop.permute.xlu0 %114  ;;  %v110_v5 = vpop.permute.xlu1 %109 }
  0x87   :  { %v244_v47 = vpop.f32.mrf.mxu2 }
  0x88   :  { %v245_v16 = vadd.f32 %v244_v47, %v115_v1 }
  0x89   :  { %v784_v48 = vpop.f32.mrf.mxu0 }
  0x8a   :  { %v221_v38 = vadd.f32 %v784_v48, %v75_v33  ;;  %v282_v48 = vld [vmem:[%s848_s3 + $0x8] sm:$0xff] }
  0x8c   :  { %v100_v10 = vpop.permute.xlu0 %99  ;;  %v95_v17 = vpop.permute.xlu1 %94 }
  0x8f   :  { %v247_v49 = vpop.f32.mrf.mxu2 }
  0x90   :  { %v248_v13 = vadd.f32 %v247_v49, %v120_v63  ;;  %v288_v49 = vld [vmem:[%s848_s3 + $0x38] sm:$0xff] }
  0x91   :  { %v786_v50 = vpop.f32.mrf.mxu0 }
  0x94   :  { %v85_v23 = vpop.permute.xlu0 %84  ;;  %v80_v30 = vpop.permute.xlu1 %79 }
  0x95   :  { %v224_v35 = vadd.f32 %v786_v50, %v80_v30  ;;  %v283_v50 = vld [vmem:[%s848_s3 + $0x10] sm:$0xff] }
  0x97   :  { %v250_v51 = vpop.f32.mrf.mxu2 }
  0x98   :  { %v251_v11 = vadd.f32 %v250_v51, %v125_v57  ;;  %v284_v51 = vld [vmem:[%s848_s3 + $0x18] sm:$0xff]  ;;  %v330_v57 = vpop.permute.xlu2 %329 }
  0x99   :  { %v788_v52 = vpop.f32.mrf.mxu0 }
  0x9a   :  { %v227_v32 = vadd.f32 %v788_v52, %v85_v23  ;;  %v285_v52 = vld [vmem:[%s848_s3 + $0x20] sm:$0xff] }
  0x9c   :  { %v70_v36 = vpop.permute.xlu0 %69 }
  0x9d   :  { %v218_v40 = vadd.f32 %v782_v46, %v70_v36  ;;  %v287_v46 = vld [vmem:[%s848_s3 + $0x30] sm:$0xff] }
  0x9f   :  { %v253_v54 = vpop.f32.mrf.mxu2 }
  0xa0   :  { %v254_v9 = vadd.f32 %v253_v54, %v130_v61 }
  0xa1   :  { %v229_v55 = vpop.f32.mrf.mxu0 }
  0xa2   :  { %v230_v29 = vadd.f32 %v229_v55, %v90_v20 }
  0xa7   :  { %v256_v58 = vpop.f32.mrf.mxu2 }
  0xa8   :  { %v257_v7 = vadd.f32 %v256_v58, %v135_v56  ;;  %v335_v58 = vpop.permute.xlu1 %334 }
  0xa9   :  { %v232_v60 = vpop.f32.mrf.mxu0 }
  0xaa   :  { %v233_v27 = vadd.f32 %v232_v60, %v95_v17 }
  0xaf   :  { %v259_v62 = vpop.f32.mrf.mxu2 }
  0xb0   :  { %v260_v3 = vadd.f32 %v259_v62, %v140_v59 }
  0xb1   :  { %v235_v0 = vpop.f32.mrf.mxu0 }
  0xb2   :  { %v236_v25 = vadd.f32 %v235_v0, %v100_v10 }
  0xb7   :  { %v262_v2 = vpop.f32.mrf.mxu2 }
  0xb8   :  { %v263_v4 = vadd.f32 %v262_v2, %v145_v53  ;;  %v286_v53 = vld [vmem:[%s848_s3 + $0x28] sm:$0xff] }
  0xb9   :  { %v238_v6 = vpop.f32.mrf.mxu0 }
  0xba   :  { %527 = vtanh.f32 %v263_v4  ;;  %v239_v22 = vadd.f32 %v238_v6, %v105_v8  ;;  %v320_v4 = vpop.permute.xlu1 %319 }
  0xbb   :  { %529 = vtanh.f32 %v260_v3  ;;  %v325_v3 = vpop.permute.xlu0 %324 }
  0xbc   :  { %531 = vtanh.f32 %v257_v7 }
  0xbd   :  { %533 = vtanh.f32 %v254_v9 }
  0xbe   :  { %535 = vtanh.f32 %v251_v11 }
  0xbf   :  { %537 = vtanh.f32 %v248_v13 }
  0xc0   :  { %v528_v12 = vpop.eup %527  ;;  %539 = vtanh.f32 %v245_v16 }
  0xc1   :  { %v241_v14 = vpop.f32.mrf.mxu0  ;;  %337 = vmatpush.msra.mxu1 %v528_v12  ;;  %507 = vmatpush.msra.mxu3 %v528_v12  ;;  %v530_v15 = vpop.eup %529 }
  0xc2   :  { %v532_v18 = vpop.eup %531  ;;  %v242_v19 = vadd.f32 %v241_v14, %v110_v5  ;;  %v315_v5 = vpop.permute.xlu2 %314 }
  0xc3   :  { %338 = vmatpush.msra.mxu1 %v530_v15  ;;  %508 = vmatpush.msra.mxu3 %v530_v15  ;;  %v534_v21 = vpop.eup %533  ;;  %v310_v10 = vpop.permute.xlu0 %309 }
  0xc4   :  { %v536_v24 = vpop.eup %535  ;;  %541 = vtanh.f32 %v242_v19  ;;  %v305_v12 = vpop.permute.xlu1 %304 }
  0xc5   :  { %339 = vmatpush.msra.mxu1 %v532_v18  ;;  %509 = vmatpush.msra.mxu3 %v532_v18  ;;  %v538_v26 = vpop.eup %537  ;;  %543 = vtanh.f32 %v239_v22  ;;  %v432_v22 = vld [vmem:[%s850_s7] sm:$0xff] }
  0xc6   :  { %v540_v28 = vpop.eup %539  ;;  %545 = vtanh.f32 %v236_v25  ;;  %v433_v25 = vld [vmem:[%s850_s7 + $0x8] sm:$0x1] }
  0xc7   :  { %340 = vmatpush.msra.mxu1 %v534_v21  ;;  %510 = vmatpush.msra.mxu3 %v534_v21  ;;  %547 = vtanh.f32 %v233_v27  ;;  %v386_v21 = vld [vmem:[%s849_s5] sm:$0xff] }
  0xc8   :  { %549 = vtanh.f32 %v230_v29 }
  0xc9   :  { %341 = vmatpush.msra.mxu1 %v536_v24  ;;  %511 = vmatpush.msra.mxu3 %v536_v24  ;;  %551 = vtanh.f32 %v227_v32  ;;  %v387_v24 = vld [vmem:[%s849_s5 + $0x8] sm:$0x1] }
  0xca   :  { %v542_v31 = vpop.eup %541  ;;  %553 = vtanh.f32 %v224_v35  ;;  %v300_v14 = vpop.permute.xlu2 %299 }
  0xcb   :  { %342 = vmatpush.msra.mxu1 %v538_v26  ;;  %512 = vmatpush.msra.mxu3 %v538_v26  ;;  %v544_v34 = vpop.eup %543  ;;  %555 = vtanh.f32 %v221_v38  ;;  %v393_v26 = vpop.permute.xlu0 %392 }
  0xcc   :  { %v546_v37 = vpop.eup %545  ;;  %557 = vtanh.f32 %v218_v40  ;;  %v398_v32 = vpop.permute.xlu1 %397 }
  0xcd   :  { %343 = vmatpush.msra.mxu1 %v540_v28  ;;  %513 = vmatpush.msra.mxu3 %v540_v28  ;;  %v548_v39 = vpop.eup %547 }
  0xce   :  { %v550_v41 = vpop.eup %549 }
  0xcf   :  { %344 = vmatpush.msra.mxu1 %v542_v31  ;;  %514 = vmatpush.msra.mxu3 %v542_v31  ;;  %v552_v42 = vpop.eup %551 }
  0xd0   :  { %v554_v43 = vpop.eup %553 }
  0xd1   :  { %345 = vmatpush.msra.mxu1 %v544_v34  ;;  %515 = vmatpush.msra.mxu3 %v544_v34  ;;  %v556_v44 = vpop.eup %555 }
  0xd2   :  { %v558_v47 = vpop.eup %557  ;;  %v439_v27 = vpop.permute.xlu2 %438 }
  0xd3   :  { %346 = vmatpush.msra.mxu1 %v546_v37  ;;  %516 = vmatpush.msra.mxu3 %v546_v37  ;;  %v444_v33 = vpop.permute.xlu0 %443 }
  0xd5   :  { %347 = vmatpush.msra.mxu1 %v548_v39  ;;  %517 = vmatpush.msra.mxu3 %v548_v39 }
  0xd7   :  { %348 = vmatpush.msra.mxu1 %v550_v41  ;;  %518 = vmatpush.msra.mxu3 %v550_v41 }
  0xd9   :  { %349 = vmatpush.msra.mxu1 %v552_v42  ;;  %519 = vmatpush.msra.mxu3 %v552_v42 }
  0xdb   :  { %350 = vmatpush.msra.mxu1 %v554_v43  ;;  %520 = vmatpush.msra.mxu3 %v554_v43 }
  0xdd   :  { %351 = vmatpush.msra.mxu1 %v556_v44  ;;  %521 = vmatpush.msra.mxu3 %v556_v44 }
  0xdf   :  { %352 = vmatpush.msra.mxu1 %v558_v47  ;;  %522 = vmatpush.msra.mxu3 %v558_v47 }
  0xe0   :  { %353 = vmatmul.f32.vlgmr.msra.gmra.mxu1 %v281_v45  ;;  %371 = vmatmul.f32.vlgmr.msra.gmra.mxu3 %v287_v46 }
  0xe8   :  { %356 = vmatmul.f32.gmra.mxu1 %v282_v48  ;;  %374 = vmatmul.f32.gmra.mxu3 %v288_v49 }
  0xf0   :  { %359 = vmatmul.f32.gmra.mxu1 %v283_v50 }
  0xf8   :  { %362 = vmatmul.f32.gmra.mxu1 %v284_v51 }
 0x100   :  { %365 = vmatmul.f32.gmra.mxu1 %v285_v52 }
 0x108   :  { %368 = vmatmul.f32.gmra.mxu1 %v286_v53 }
 0x15d   :  { %v354_v54 = vpop.f32.mrf.mxu1 }
 0x15e   :  { %v355_v16 = vadd.f32 %v354_v54, %v300_v14 }
 0x163   :  { %v372_v55 = vpop.f32.mrf.mxu3 }
 0x164   :  { %v373_v60 = vadd.f32 %v372_v55, %v330_v57 }
 0x165   :  { %v357_v56 = vpop.f32.mrf.mxu1 }
 0x166   :  { %v358_v13 = vadd.f32 %v357_v56, %v305_v12 }
 0x16b   :  { %v375_v59 = vpop.f32.mrf.mxu3 }
 0x16c   :  { %v376_v61 = vadd.f32 %v375_v59, %v335_v58 }
 0x16d   :  { %v360_v62 = vpop.f32.mrf.mxu1 }
 0x16e   :  { %559 = vtanh.f32 %v376_v61  ;;  %v361_v11 = vadd.f32 %v360_v62, %v310_v10 }
 0x16f   :  { %561 = vtanh.f32 %v373_v60 }
 0x174   :  { %v560_v63 = vpop.eup %559 }
 0x175   :  { %v363_v0 = vpop.f32.mrf.mxu1  ;;  %415 = vmatpush.msrb.mxu2 %v560_v63  ;;  %460 = vmatpush.msrb.mxu3 %v560_v63  ;;  %v562_v1 = vpop.eup %561 }
 0x176   :  { %v364_v9 = vadd.f32 %v363_v0, %v315_v5 }
 0x177   :  { %416 = vmatpush.msrb.mxu2 %v562_v1  ;;  %461 = vmatpush.msrb.mxu3 %v562_v1 }
 0x17d   :  { %v366_v2 = vpop.f32.mrf.mxu1 }
 0x17e   :  { %v367_v7 = vadd.f32 %v366_v2, %v320_v4 }
 0x185   :  { %v369_v6 = vpop.f32.mrf.mxu1 }
 0x186   :  { %v370_v8 = vadd.f32 %v369_v6, %v325_v3 }
 0x188   :  { %563 = vtanh.f32 %v370_v8 }
 0x189   :  { %565 = vtanh.f32 %v367_v7 }
 0x18a   :  { %567 = vtanh.f32 %v364_v9 }
 0x18b   :  { %569 = vtanh.f32 %v361_v11 }
 0x18c   :  { %571 = vtanh.f32 %v358_v13 }
 0x18d   :  { %573 = vtanh.f32 %v355_v16 }
 0x18e   :  { %v564_v15 = vpop.eup %563 }
 0x18f   :  { %417 = vmatpush.msrb.mxu2 %v564_v15  ;;  %462 = vmatpush.msrb.mxu3 %v564_v15  ;;  %v566_v17 = vpop.eup %565 }
 0x190   :  { %v568_v18 = vpop.eup %567 }
 0x191   :  { %418 = vmatpush.msrb.mxu2 %v566_v17  ;;  %463 = vmatpush.msrb.mxu3 %v566_v17  ;;  %v570_v19 = vpop.eup %569 }
 0x192   :  { %v572_v20 = vpop.eup %571 }
 0x193   :  { %419 = vmatpush.msrb.mxu2 %v568_v18  ;;  %464 = vmatpush.msrb.mxu3 %v568_v18  ;;  %v574_v23 = vpop.eup %573 }
 0x195   :  { %420 = vmatpush.msrb.mxu2 %v570_v19  ;;  %465 = vmatpush.msrb.mxu3 %v570_v19 }
 0x197   :  { %421 = vmatpush.msrb.mxu2 %v572_v20  ;;  %466 = vmatpush.msrb.mxu3 %v572_v20 }
 0x199   :  { %422 = vmatpush.msrb.mxu2 %v574_v23  ;;  %467 = vmatpush.msrb.mxu3 %v574_v23 }
 0x19a   :  { %502 = vmatmul.msk.f32.vlgmr.msrb.gmra.mxu2 %vm400_vm2, %v386_v21  ;;  %504 = vmatmul.msk.f32.vlgmr.msrb.gmra.mxu3 %vm400_vm2, %v432_v22 }
 0x1a2   :  { %503 = vmatmul.msk.f32.gmra.mxu2 %vm400_vm2, %v387_v24  ;;  %505 = vmatmul.msk.f32.gmra.mxu3 %vm400_vm2, %v433_v25 }
 0x21d   :  { %v424_v28 = vpop.f32.mrf.mxu2  ;;  %v469_v29 = vpop.f32.mrf.mxu3 }
 0x21e   :  { %v425_v30 = vadd.f32 %v424_v28, %v393_v26  ;;  %v470_v31 = vadd.f32 %v469_v29, %v439_v27 }
 0x220   :  { %430 = vst [vmem:[%s851_s9] sm:$0xff] %v425_v30 }
 0x221   :  { %475 = vst [vmem:[%s852_s10] sm:$0xff] %v470_v31 }
 0x225   :  { %v427_v34 = vpop.f32.mrf.mxu2  ;;  %v472_v35 = vpop.f32.mrf.mxu3 }
 0x226   :  { %v428_v36 = vadd.f32 %v427_v34, %v398_v32  ;;  %v473_v37 = vadd.f32 %v472_v35, %v444_v33 }
 0x228   :  { %431 = vst [vmem:[%s851_s9 + $0x8] sm:$0x1] %v428_v36 }
 0x229   :  { %476 = vst [vmem:[%s852_s10 + $0x8] sm:$0x1] %v473_v37 }

</bundles_post_ra>
